<compile_context>
chip_gen: v6e
topology: v6e:2x2x1
jax: 0.10.0
libtpu: 0.0.40
codegen_flags: <defaults>
</compile_context>

<pallas_src>
import jax
import jax.numpy as jnp
from jax.experimental import pallas as pl
from jax.experimental.pallas import tpu as pltpu


def _round_up(a, b):
    return ((a + b - 1) // b) * b


# -----------------------------------------------------------------------------
# Pallas kernel: one row tile = a single fused GEMM + bias
# -----------------------------------------------------------------------------
def raft_rowblock_kernel(xp_ref, w_ref, b_ref, out_ref):
    """Per grid step:
       xp_ref : (Rt, K)   rows = flattened (batch, channel); columns are
                          [raw x history | concatenated downsampled retrieval]
       w_ref  : (K, Pp)   fully folded weights (x_offset + two-stage projection
                          + per-period retrieval heads all folded in)
       b_ref  : (1, Pp)   folded bias
       out_ref: (Rt, Pp)  float32
    """
    acc = jnp.dot(xp_ref[...], w_ref[...], preferred_element_type=jnp.float32)
    out_ref[...] = (acc + b_ref[...]).astype(out_ref.dtype)


# -----------------------------------------------------------------------------
# One-time weight folding (hoist out of the per-call path)
# -----------------------------------------------------------------------------
def fold_raft_params(params, seq_len, pred_len, *, compute_dtype=jnp.bfloat16):
    """Folds linear_x, retrieval_pred[i], linear_pred and the last-step offset
       into a single (seq_len + sum(P//g), P_pad) weight matrix + (1, P_pad) bias.
    """
    S, P = seq_len, pred_len
    wp_top = params["wp"][:P, :]                            # (P, P)
    wp_bot = params["wp"][P:, :]                            # (P, P)
    w1 = params["wx"] @ wp_top                              # (S, P)
    wr_cat = jnp.concatenate(params["wr"], axis=0)          # (Kr, P)
    w2 = wr_cat @ wp_bot                                    # (Kr, P)
    # Fold the last-step offset:   x_norm @ W1 + x_off  ==  x @ W1'
    # with W1'[S-1, :] = W1[S-1, :] + 1 - colsum(W1)   (x_off = x[:, S-1]).
    w1 = w1.at[S - 1, :].add(1.0 - jnp.sum(w1, axis=0))
    b = params["bx"] @ wp_top + sum(params["br"]) @ wp_bot + params["bp"]   # (1, P)

    # Lane-dense output only when pred_len is large enough that padding is cheap.
    P_pad = _round_up(P, 128) if P >= 128 else P
    if P_pad != P:
        # pad AFTER the offset fold so padded columns stay exactly zero
        w1 = jnp.pad(w1, ((0, 0), (0, P_pad - P)))
        w2 = jnp.pad(w2, ((0, 0), (0, P_pad - P)))
        b = jnp.pad(b, ((0, 0), (0, P_pad - P)))

    w_cat = jnp.concatenate([w1, w2], axis=0)               # (S + Kr, P_pad)
    return w_cat.astype(compute_dtype), b.astype(jnp.float32)


# -----------------------------------------------------------------------------
# Forward: gather / downsample (plain JAX glue) + pallas_call
# -----------------------------------------------------------------------------
def raft_forward(x_enc, index, retrieval_table, w_cat, b_eff, period_num,
                 pred_len, *, row_tile=512, compute_dtype=jnp.bfloat16):
    """x_enc: (B, seq_len, C) float32
       index: (B,) int32 rows into the retrieval table
       retrieval_table: (n_period, N, pred_len, C)  (stands in for retrieval_dict[mode])
       w_cat/b_eff: output of fold_raft_params
       returns: (B, pred_len, C) float32
    """
    B, S, C = x_enc.shape
    P = pred_len
    rows = B * C
    K_cat, P_pad = w_cat.shape

    # (B, S, C) -> (B*C, S).
    # TODO(synk): this transpose (and the one on the output) is an extra HBM
    # pass; could be eliminated with a 3-D BlockSpec + in-kernel transpose.
    x_rows = jnp.transpose(x_enc, (0, 2, 1)).reshape(rows, S)

    # Retrieval gather + stride-g downsample (only the stride-0 elements are
    # materialized), flattened to (B*C, P//g) rows and concatenated on the
    # contraction axis.
    # TODO(synk): could become a scalar-prefetch-driven BlockSpec gather
    # (index / stride via PrefetchScalarGridSpec); kept as JAX glue.
    pr_rows = []
    for i, g in enumerate(period_num):
        pr = retrieval_table[i][index][:, ::g, :]            # (B, P//g, C)
        pr_rows.append(jnp.transpose(pr, (0, 2, 1)).reshape(rows, P // g))
    xp = jnp.concatenate([x_rows] + pr_rows, axis=-1).astype(compute_dtype)
    assert xp.shape[1] == K_cat

    # Row tile: multiple of 128 and >= 2 blocks (v7x: two TensorCores) when
    # there are enough rows; otherwise a single sublane-aligned block.
    if rows >= 256:
        rt = max(128, min(_round_up(row_tile, 128),
                          _round_up((rows + 1) // 2, 128)))
    else:
        rt = _round_up(rows, 8)
    R_pad = _round_up(rows, rt)
    if R_pad != rows:
        xp = jnp.pad(xp, ((0, R_pad - rows), (0, 0)))

    # Explicit VMEM budget (double-buffered xp/out + invariant weights/bias),
    # capped at 48 MiB so it stays safe on v7x's 64 MiB physical VMEM.
    in_bytes = jnp.dtype(compute_dtype).itemsize
    vmem_est = (2 * rt * K_cat * in_bytes              # xp (double buffered)
                + 2 * K_cat * P_pad * in_bytes         # weights
                + 2 * P_pad * 4                        # bias
                + 2 * rt * P_pad * 4)                  # out (double buffered)
    vmem_limit = int(min(max(2 * vmem_est, 16 << 20), 48 << 20))

    out = pl.pallas_call(
        raft_rowblock_kernel,
        out_shape=jax.ShapeDtypeStruct((R_pad, P_pad), jnp.float32),
        grid=(R_pad // rt,),
        in_specs=[
            pl.BlockSpec((rt, K_cat), lambda r: (r, 0)),      # activation rows
            pl.BlockSpec((K_cat, P_pad), lambda r: (0, 0)),   # folded weights (grid-invariant)
            pl.BlockSpec((1, P_pad), lambda r: (0, 0)),       # folded bias (grid-invariant)
        ],
        out_specs=pl.BlockSpec((rt, P_pad), lambda r: (r, 0)),
        compiler_params=pltpu.CompilerParams(
            dimension_semantics=("parallel",),
            vmem_limit_bytes=vmem_limit),
    )(xp, w_cat, b_eff)

    out = out[:rows, :P].reshape(B, C, P)                    # drop row/lane padding
    return jnp.transpose(out, (0, 2, 1))                     # (B, P, C)


# -----------------------------------------------------------------------------
# Pure-JAX reference (mirrors the PyTorch encoder) for verification
# -----------------------------------------------------------------------------
def raft_reference(x_enc, index, retrieval_table, params, period_num):
    B, S, C = x_enc.shape
    P = params["wx"].shape[1]
    x_off = x_enc[:, -1:, :]
    x_norm = x_enc - x_off
    x_pred = jnp.einsum("bsc,sp->bpc", x_norm, params["wx"]) + params["bx"][0][None, :, None]
    pr_from_retrieval = jnp.take(retrieval_table, index, axis=1)
    rsum = jnp.zeros((B, P, C), jnp.float32)
    for i, g in enumerate(period_num):
        pr = pr_from_retrieval[i].reshape(B, P // g, g, C)[:, :, 0, :]
        rp = jnp.einsum("bqc,qp->bpc", pr, params["wr"][i]) + params["br"][i][0][None, :, None]
        rsum = rsum + rp
    cat = jnp.concatenate([x_pred, rsum], axis=1)             # (B, 2P, C)
    pred = jnp.einsum("btc,tp->bpc", cat, params["wp"]) + params["bp"][0][None, :, None]
    return pred + x_off


# -----------------------------------------------------------------------------
# Main
# -----------------------------------------------------------------------------
if __name__ == "__main__":
    # small config (configs.seq_len / pred_len / enc_in / n_period / topm)
    bsz = 2
    seq_len = 16
    pred_len = 8
    channels = 4
    n_period = 2
    period_num = [2, 4]          # rt.period_num[-n_period:]; pred_len divisible by each
    n_table = 8                  # rows in the (synthetic) retrieval table

    key = jax.random.PRNGKey(0)
    keys = jax.random.split(key, 16)

    # Deterministic synthetic parameters (weights stored pre-transposed: (in, out)).
    params = {
        "wx": 0.1 * jax.random.normal(keys[0], (seq_len, pred_len), jnp.float32),
        "bx": 0.1 * jax.random.normal(keys[1], (1, pred_len), jnp.float32),
        "wr": [
            0.1 * jax.random.normal(keys[2 + i], (pred_len // g, pred_len), jnp.float32)
            for i, g in enumerate(period_num)
        ],
        "br": [
            0.1 * jax.random.normal(keys[6 + i], (1, pred_len), jnp.float32)
            for i in range(n_period)
        ],
        "wp": 0.1 * jax.random.normal(keys[10], (2 * pred_len, pred_len), jnp.float32),
        "bp": 0.1 * jax.random.normal(keys[11], (1, pred_len), jnp.float32),
    }

    # Inputs.
    x_enc = jax.random.normal(keys[12], (bsz, seq_len, channels), jnp.float32)
    index = jnp.array([1, 5], dtype=jnp.int32)
    # TODO(synk): RetrievalTool.prepare_dataset / retrieve_all (data-dependent
    # nearest-neighbour retrieval over a training set) is replaced by a
    # deterministic synthetic retrieval table standing in for retrieval_dict[mode].
    retrieval_table = jax.random.normal(
        keys[13], (n_period, n_table, pred_len, channels), jnp.float32
    )

    # Fold weights once (would be cached across calls in a real deployment).
    w_cat, b_eff = fold_raft_params(params, seq_len, pred_len,
                                    compute_dtype=jnp.bfloat16)

    out = raft_forward(x_enc, index, retrieval_table, w_cat, b_eff,
                       period_num, pred_len, compute_dtype=jnp.bfloat16)
    out = jax.block_until_ready(out)

    ref = raft_reference(x_enc, index, retrieval_table, params, period_num)
    assert out.shape == (bsz, pred_len, channels)
    # bf16 matmul inputs (f32 accumulation) -> loosened tolerance vs f32 reference.
    assert jnp.allclose(out, ref, atol=2e-2, rtol=2e-2), (
        f"max abs err {jnp.max(jnp.abs(out - ref))}"
    )
    print("KERNEL_OK")
</pallas_src>

<mosaic_0001>
module attributes {stable_mosaic.version = 11 : i64} {
  func.func @raft_rowblock_kernel(%arg0: i32, %arg1: memref<8x22xbf16, #tpu.memory_space<vmem>>, %arg2: memref<22x8xbf16, #tpu.memory_space<vmem>>, %arg3: memref<1x8xf32, #tpu.memory_space<vmem>>, %arg4: memref<8x8xf32, #tpu.memory_space<vmem>>) attributes {dimension_semantics = [#tpu.dimension_semantics<parallel>], iteration_bounds = array<i64: 1>, scalar_prefetch = 0 : i64, scratch_operands = 0 : i64, tpu.core_type = #tpu.core_type<tc>, window_params = [{transform_indices = @transform_0, window_bounds = array<i64: 8, 22>}, {pipeline_mode = #tpu.pipeline_mode<synchronous>, transform_indices = @transform_1, window_bounds = array<i64: 22, 8>}, {pipeline_mode = #tpu.pipeline_mode<synchronous>, transform_indices = @transform_2, window_bounds = array<i64: 1, 8>}, {transform_indices = @transform_3, window_bounds = array<i64: 8, 8>}]} {
    %c0 = arith.constant 0 : index
    %c0_0 = arith.constant 0 : index
    %0 = vector.load %arg1[%c0, %c0_0] : memref<8x22xbf16, #tpu.memory_space<vmem>>, vector<8x22xbf16>
    %c0_1 = arith.constant 0 : index
    %c0_2 = arith.constant 0 : index
    %1 = vector.load %arg2[%c0_1, %c0_2] : memref<22x8xbf16, #tpu.memory_space<vmem>>, vector<22x8xbf16>
    %cst = arith.constant dense<0.000000e+00> : vector<8x8xf32>
    %2 = tpu.matmul %0, %1, %cst {dimension_numbers = #tpu.dot_dimension_numbers<[1], [0], [0], [1], [0, 0, 1, 1], [], []>} : vector<8x22xbf16>, vector<22x8xbf16>, vector<8x8xf32> -> vector<8x8xf32>
    %c0_3 = arith.constant 0 : index
    %c0_4 = arith.constant 0 : index
    %3 = vector.load %arg3[%c0_3, %c0_4] : memref<1x8xf32, #tpu.memory_space<vmem>>, vector<1x8xf32>
    %4 = vector.broadcast %3 : vector<1x8xf32> to vector<8x8xf32>
    %5 = arith.addf %2, %4 : vector<8x8xf32>
    %c0_5 = arith.constant 0 : index
    %c0_6 = arith.constant 0 : index
    %6 = vector.load %arg4[%c0_5, %c0_6] : memref<8x8xf32, #tpu.memory_space<vmem>>, vector<8x8xf32>
    tpu.vector_store %arg4[%c0_5, %c0_6], %5 {strides = array<i32>} : memref<8x8xf32, #tpu.memory_space<vmem>>, vector<8x8xf32>,
    return
  }
  func.func @transform_0(%arg0: i32) -> (i32, i32) {
    %c0_i32 = arith.constant 0 : i32
    %c0_i32_0 = arith.constant 0 : i32
    return %arg0, %c0_i32 : i32, i32
  }
  func.func @transform_1(%arg0: i32) -> (i32, i32) {
    %c0_i32 = arith.constant 0 : i32
    %c0_i32_0 = arith.constant 0 : i32
    %c0_i32_1 = arith.constant 0 : i32
    return %c0_i32, %c0_i32_0 : i32, i32
  }
  func.func @transform_2(%arg0: i32) -> (i32, i32) {
    %c0_i32 = arith.constant 0 : i32
    %c0_i32_0 = arith.constant 0 : i32
    %c0_i32_1 = arith.constant 0 : i32
    return %c0_i32, %c0_i32_0 : i32, i32
  }
  func.func @transform_3(%arg0: i32) -> (i32, i32) {
    %c0_i32 = arith.constant 0 : i32
    %c0_i32_0 = arith.constant 0 : i32
    return %arg0, %c0_i32 : i32, i32
  }
}

</mosaic_0001>

<bundles_post_ra>
// kernel: tpu_custom_call.1
= control target key start
LH: loop header
LB: loop body
LE: loop exit
PB: predicated region body
PF: predicated region fallthrough
CT: control target
= control target key end

     0   :  { %v142_v1 = vmov 0.0   ;;  %vm40_vm0 = vcmask 1042432   ;;  %vm143_vm1 = vmmov 0   ;;  %s180_s0 = inlined_call_operand.vmem [shape: bf16[8,22], index: 0, kind: input, shape index: {}]   ;;  %s181_s1 = inlined_call_operand.vmem [shape: bf16[22,8], index: 1, kind: input, shape index: {}]   ;;  %s182_s2 = inlined_call_operand.vmem [shape: f32[1,8], index: 2, kind: input, shape index: {}]   ;;  %s183_s3 = inlined_call_operand.hbm [shape: f32[8,8], index: 3, kind: output, shape index: {}]  }
   0x1   :  { %v118_v0 = vld [vmem:[%s181_s1 + $0x8] ss:$0 sps:$4 sm:$0x77]   ;;  %107 = vmatprep.subr.bf16.mxu0 %v142_v1  ;;  %v119_v3 = vld [vmem:[%s181_s1] sm:$0xff]   ;;  %111 = vmatprep.mubr.msk.bf16.mxu0 %vm143_vm1, %v142_v1 }
   0x2   :  { %v42_v2 = vsel %vm40_vm0, %v118_v0, 0 }
   0x3   :  { %108 = vmatpush3.bf16.msra.mxu0 %v42_v2 }
   0x4   :  { %8 = vsyncpa [#allocation3], 0  ;;  %109 = vmatprep.subr.bf16.mxu0 %v142_v1  ;;  %v16_v4 = vld [vmem:[%s180_s0] sm:$0xf]  ;;  %vm36_vm2 = vcmask 179200   ;;  %s144_s20 = smov [#allocation2]  }
   0x5   :  { %v100_v5 = vld [vmem:[%s182_s2] ss:$0 sm:$0xff]  ;;  %s92_s21 = sshll.u32 %s144_s20, 4  ;;  %vm84_vm3 = vcmask 64512   ;;  %s93_s21 = int_to_ptr.vmem [resolvable:$true] %s92_s21 }
   0x6   :  { %s120_s1 = scalar_lea.vmem %s93_s21, 128  ;;  %p125_p1 = scmp.lt.s32.totalorder %s93_s21, %s93_s21 }
   0x7   :  { %110 = vmatpush3.bf16.msra.mxu0 %v119_v3  ;;  %p121_p0 = scmp.ne.s32.totalorder %s93_s21, %s120_s1  ;;  %p126_p2 = scmp.lt.s32.totalorder %s120_s1, %s120_s1 }
   0x9   :  { %p127_p3 = por %p126_p2, %p125_p1 }
   0xa   :  { %112 = vmatmul.mubr.msk.bf16.vlgmr.msra.gmra.mxu0 %vm36_vm2, %v16_v4 }
   0xb   :  { %p128_p4 = pnand %p127_p3, %p121_p0 }
  0xca   :  { %v78_v6 = vpop.f32.mrf.mxu0 }
  0xcb   :  { %v79_v7 = vadd.f32 %v100_v5, %v78_v6 }
  0xcc   :  { %v113_v8 = vpop.f32.mrf.mxu0 }
  0xcd   :  { %85 = vst.msk [vmem:[#allocation2] sm:$0xff] %vm84_vm3, %v79_v7 }
  0xce   :  { %v81_v9 = vpop.f32.mrf.mxu0 }
  0xcf   :  { %131 = shalt.err (!%p128_p4)
}
  0xd0   :  { %95 = dma.vmem_to_hbm [thread:$0]  %s93_s21, 128, %s183_s3, [#allocation3]   ;;  %v114_v10 = vpop.f32.mrf.mxu0 }
  0xd1   :  { %140 = dma.done.wait [#allocation3], 128  }
  0xd2   :  { %141 = vsyncadd [#allocation3], 4294967168 }
  0xd3   :  { %99 = vsyncpa [#allocation3], 1 }

</bundles_post_ra>
